<compile_context>
chip_gen: v7x
topology: tpu7x:2x2x1
jax: 0.10.0
libtpu: 0.0.40
codegen_flags: <defaults>
</compile_context>

<pallas_src>
import jax
import jax.numpy as jnp
from jax.experimental import pallas as pl
from jax.experimental.pallas import tpu as pltpu

# ---------------- small, deterministic shapes ----------------
B = 2                      # batch
NUM_AUS = 17               # facial action units per sample
K_PAD = 128                # AU dim zero-padded (in-kernel) to a lane-dense MXU operand
HIDDEN = 64                # au_processor hidden width
SEQ = 8                    # prompt sequence length
EMBED = 32                 # prompt embedding dim
SEQ_EMBED = SEQ * EMBED    # 256
C, H, W = 3, 16, 16
CHW = C * H * W            # 768  (multiple of 128 -> lane dense)
LANE = 128
ROWS_PER_B = CHW // LANE   # 6 lane-rows per batch element
ROWS = B * ROWS_PER_B      # 12
NUM_TRAIN_TIMESTEPS = 1000
BETA_START, BETA_END = 1e-4, 0.02


# ---------------- fused kernel: MLP + DDPM add_noise ----------------
def fused_kernel(ts_ref, sacp_ref, s1macp_ref,            # SMEM: (B,) i32, (1000,) f32 x2
                 au_ref, w1_ref, b1_ref, w2_ref, b2_ref,   # VMEM MLP operands (au is (B, 17))
                 x_ref, noise_ref,                         # VMEM images, (ROWS, LANE)
                 pe_ref, noisy_ref,                        # VMEM outputs
                 au_pad_ref):                              # VMEM scratch (B, K_PAD)
    # ---- 1) AU -> prompt embedding MLP (MXU) ----
    # K-pad the activation inside the kernel (removes the standalone XLA pad dispatch).
    # Correctness invariant: w1 rows >= NUM_AUS are zero (done at init) AND the activation's
    # padding columns are zero (done here), so the padded K=128 contraction is exact.
    au_pad_ref[...] = jnp.zeros_like(au_pad_ref)
    au_pad_ref[:, :NUM_AUS] = au_ref[...]
    h = jnp.dot(au_pad_ref[...], w1_ref[...],
                preferred_element_type=jnp.float32) + b1_ref[...]
    h = jnp.maximum(h, 0.0)  # ReLU
    pe = jnp.dot(h, w2_ref[...], preferred_element_type=jnp.float32) + b2_ref[...]
    pe_ref[...] = pe.astype(pe_ref.dtype)

    # ---- 2) DDPM add_noise (epsilon prediction, linear betas) ----
    # noisy = sqrt(acp[t_b]) * x0 + sqrt(1 - acp[t_b]) * eps
    # Both sqrt tables are precomputed; only SMEM scalar gathers + VPU FMA remain here.
    # NOTE: the where-chain below is O(B) broadcasts/selects; fine at B=2, replace with a
    # gathered per-row coefficient column if B ever grows.
    row = jax.lax.broadcasted_iota(jnp.int32, (ROWS, LANE), 0)
    sa = jnp.full((ROWS, LANE), sacp_ref[ts_ref[B - 1]], dtype=jnp.float32)
    s1 = jnp.full((ROWS, LANE), s1macp_ref[ts_ref[B - 1]], dtype=jnp.float32)
    for b in range(B - 2, -1, -1):
        mask = row < (b + 1) * ROWS_PER_B
        sa = jnp.where(mask, sacp_ref[ts_ref[b]], sa)
        s1 = jnp.where(mask, s1macp_ref[ts_ref[b]], s1)
    noisy_ref[...] = (sa * x_ref[...] + s1 * noise_ref[...]).astype(noisy_ref.dtype)


# ---------------- DDPMScheduler constants (module specifies beta_schedule='linear') ----------------
def make_ddpm_scheduler():
    betas = jnp.linspace(BETA_START, BETA_END, NUM_TRAIN_TIMESTEPS, dtype=jnp.float32)
    alphas_cumprod = jnp.cumprod(1.0 - betas)                # (1000,) f32
    return jnp.sqrt(alphas_cumprod), jnp.sqrt(1.0 - alphas_cumprod)


# ---------------- pipeline forward ----------------
_VMEM = pl.BlockSpec(memory_space=pltpu.MemorySpace.VMEM)
_SMEM = pl.BlockSpec(memory_space=pltpu.MemorySpace.SMEM)

_COST = pl.CostEstimate(
    flops=2 * B * K_PAD * HIDDEN + 2 * B * HIDDEN * SEQ_EMBED + 3 * ROWS * LANE,
    transcendentals=0,   # sqrt tables precomputed host-side
    bytes_accessed=4 * (B * NUM_AUS + K_PAD * HIDDEN + HIDDEN + HIDDEN * SEQ_EMBED
                        + SEQ_EMBED + 3 * ROWS * LANE + B * SEQ_EMBED
                        + 2 * NUM_TRAIN_TIMESTEPS + B),
)


def au_pix2pix_forward(source_images, au_diffs, fake_images,
                       mlp_params, sched_tables, timesteps, noise):
    # source_images is accepted for interface parity with the PyTorch module; it is only
    # consumed by the (unimplemented) frozen InstructPix2Pix base UNet — see TODO below.
    w1, b1, w2, b2 = mlp_params                 # w1 pre-padded once at init to (K_PAD, HIDDEN)
    sqrt_acp, sqrt_1macp = sched_tables         # two 1-D f32[1000] tables
    x_rows = fake_images.reshape(ROWS, LANE)    # free row-major reshape, lane-dense layout
    n_rows = noise.reshape(ROWS, LANE)

    pe_flat, noisy_rows = pl.pallas_call(
        fused_kernel,
        out_shape=(jax.ShapeDtypeStruct((B, SEQ_EMBED), jnp.float32),
                   jax.ShapeDtypeStruct((ROWS, LANE), jnp.float32)),
        in_specs=[_SMEM, _SMEM, _SMEM,                     # timesteps, sqrt tables
                  _VMEM, _VMEM, _VMEM, _VMEM, _VMEM,       # au, w1, b1, w2, b2
                  _VMEM, _VMEM],                           # x, noise
        out_specs=(_VMEM, _VMEM),
        scratch_shapes=[pltpu.VMEM((B, K_PAD), jnp.float32)],   # in-kernel K-pad buffer
        cost_estimate=_COST,
    )(timesteps, sqrt_acp, sqrt_1macp, au_diffs, w1, b1, w2, b2, x_rows, n_rows)

    prompt_embeds = pe_flat.reshape(B, SEQ, EMBED)
    noisy_targets = noisy_rows.reshape(B, C, H, W)

    # TODO(synk): self.base(image=source_images, target=..., prompt_embeds=..., ...) — the
    # frozen InstructPix2Pix UNet / 1000-step denoising loop has no in-script architecture
    # definition and is not implemented here.  When it exists: alias noisy_targets into its
    # input buffer (input_output_aliases) and emit bf16 directly from this kernel if the
    # UNet computes in bf16.
    return noisy_targets, prompt_embeds


au_pix2pix_forward_jit = jax.jit(au_pix2pix_forward)


# ---------------- deterministic parameter init ----------------
def init_au_processor_params(key):
    k1, k2, k3, k4 = jax.random.split(key, 4)
    w1 = jax.random.normal(k1, (NUM_AUS, HIDDEN), jnp.float32) * 0.05
    # Pre-pad once: rows >= NUM_AUS are zero (required for the padded-K matmul to be exact).
    w1_pad = jnp.zeros((K_PAD, HIDDEN), jnp.float32).at[:NUM_AUS, :].set(w1)
    b1 = jax.random.normal(k2, (1, HIDDEN), jnp.float32) * 0.01
    w2 = jax.random.normal(k3, (HIDDEN, SEQ_EMBED), jnp.float32) * 0.05
    b2 = jax.random.normal(k4, (1, SEQ_EMBED), jnp.float32) * 0.01
    return (w1_pad, b1, w2, b2)


if __name__ == "__main__":
    key = jax.random.PRNGKey(0)
    k_src, k_au, k_fake, k_noise, k_params = jax.random.split(key, 5)

    source_images = jax.random.normal(k_src, (B, C, H, W), jnp.float32)   # NCHW
    au_diffs = jax.random.normal(k_au, (B, NUM_AUS), jnp.float32)
    fake_images = jax.random.normal(k_fake, (B, C, H, W), jnp.float32)    # NCHW
    noise = jax.random.normal(k_noise, (B, C, H, W), jnp.float32)
    timesteps = jnp.array([100, 750], dtype=jnp.int32)                    # one t per batch elem

    mlp_params = init_au_processor_params(k_params)
    sched_tables = make_ddpm_scheduler()

    noisy_targets, prompt_embeds = au_pix2pix_forward_jit(
        source_images, au_diffs, fake_images, mlp_params, sched_tables,
        timesteps, noise)

    jax.block_until_ready(noisy_targets)
    jax.block_until_ready(prompt_embeds)

    assert noisy_targets.shape == (B, C, H, W)
    assert prompt_embeds.shape == (B, SEQ, EMBED)
    print("KERNEL_OK")
</pallas_src>

<mosaic_0001>
module attributes {stable_mosaic.version = 11 : i64} {
  func.func @fused_kernel(%arg0: memref<2xi32, #tpu.memory_space<smem>>, %arg1: memref<1000xf32, #tpu.memory_space<smem>>, %arg2: memref<1000xf32, #tpu.memory_space<smem>>, %arg3: memref<2x17xf32, #tpu.memory_space<vmem>>, %arg4: memref<128x64xf32, #tpu.memory_space<vmem>>, %arg5: memref<1x64xf32, #tpu.memory_space<vmem>>, %arg6: memref<64x256xf32, #tpu.memory_space<vmem>>, %arg7: memref<1x256xf32, #tpu.memory_space<vmem>>, %arg8: memref<12x128xf32, #tpu.memory_space<vmem>>, %arg9: memref<12x128xf32, #tpu.memory_space<vmem>>, %arg10: memref<2x256xf32, #tpu.memory_space<vmem>>, %arg11: memref<12x128xf32, #tpu.memory_space<vmem>>, %arg12: memref<2x128xf32, #tpu.memory_space<vmem>>) attributes {dimension_semantics = [], scalar_prefetch = 0 : i64, scratch_operands = 1 : i64, tpu.core_type = #tpu.core_type<tc>} {
    %cst = arith.constant 0.000000e+00 : f32
    %0 = vector.broadcast %cst : f32 to vector<2x128xf32>
    %c0 = arith.constant 0 : index
    %c0_0 = arith.constant 0 : index
    %1 = vector.load %arg12[%c0, %c0_0] : memref<2x128xf32, #tpu.memory_space<vmem>>, vector<2x128xf32>
    tpu.vector_store %arg12[%c0, %c0_0], %0 {strides = array<i32>} : memref<2x128xf32, #tpu.memory_space<vmem>>, vector<2x128xf32>,
    %c0_1 = arith.constant 0 : index
    %c0_2 = arith.constant 0 : index
    %2 = vector.load %arg3[%c0_1, %c0_2] : memref<2x17xf32, #tpu.memory_space<vmem>>, vector<2x17xf32>
    %c0_3 = arith.constant 0 : index
    %c0_4 = arith.constant 0 : index
    %3 = vector.load %arg12[%c0_3, %c0_4] : memref<2x128xf32, #tpu.memory_space<vmem>>, vector<2x17xf32>
    tpu.vector_store %arg12[%c0_3, %c0_4], %2 {strides = array<i32>} : memref<2x128xf32, #tpu.memory_space<vmem>>, vector<2x17xf32>,
    %c0_5 = arith.constant 0 : index
    %c0_6 = arith.constant 0 : index
    %4 = vector.load %arg12[%c0_5, %c0_6] : memref<2x128xf32, #tpu.memory_space<vmem>>, vector<2x128xf32>
    %c0_7 = arith.constant 0 : index
    %c0_8 = arith.constant 0 : index
    %5 = vector.load %arg4[%c0_7, %c0_8] : memref<128x64xf32, #tpu.memory_space<vmem>>, vector<128x64xf32>
    %cst_9 = arith.constant dense<0.000000e+00> : vector<2x64xf32>
    %6 = tpu.matmul %4, %5, %cst_9 {dimension_numbers = #tpu.dot_dimension_numbers<[1], [0], [0], [1], [0, 0, 1, 1], [], []>} : vector<2x128xf32>, vector<128x64xf32>, vector<2x64xf32> -> vector<2x64xf32>
    %c0_10 = arith.constant 0 : index
    %c0_11 = arith.constant 0 : index
    %7 = vector.load %arg5[%c0_10, %c0_11] : memref<1x64xf32, #tpu.memory_space<vmem>>, vector<1x64xf32>
    %8 = vector.broadcast %7 : vector<1x64xf32> to vector<2x64xf32>
    %9 = arith.addf %6, %8 : vector<2x64xf32>
    %cst_12 = arith.constant 0.000000e+00 : f32
    %10 = vector.broadcast %cst_12 : f32 to vector<2x64xf32>
    %11 = arith.maximumf %9, %10 : vector<2x64xf32>
    %c0_13 = arith.constant 0 : index
    %c0_14 = arith.constant 0 : index
    %12 = vector.load %arg6[%c0_13, %c0_14] : memref<64x256xf32, #tpu.memory_space<vmem>>, vector<64x256xf32>
    %cst_15 = arith.constant dense<0.000000e+00> : vector<2x256xf32>
    %13 = tpu.matmul %11, %12, %cst_15 {dimension_numbers = #tpu.dot_dimension_numbers<[1], [0], [0], [1], [0, 0, 1, 1], [], []>} : vector<2x64xf32>, vector<64x256xf32>, vector<2x256xf32> -> vector<2x256xf32>
    %c0_16 = arith.constant 0 : index
    %c0_17 = arith.constant 0 : index
    %14 = vector.load %arg7[%c0_16, %c0_17] : memref<1x256xf32, #tpu.memory_space<vmem>>, vector<1x256xf32>
    %15 = vector.broadcast %14 : vector<1x256xf32> to vector<2x256xf32>
    %16 = arith.addf %13, %15 : vector<2x256xf32>
    %c0_18 = arith.constant 0 : index
    %c0_19 = arith.constant 0 : index
    %17 = vector.load %arg10[%c0_18, %c0_19] : memref<2x256xf32, #tpu.memory_space<vmem>>, vector<2x256xf32>
    tpu.vector_store %arg10[%c0_18, %c0_19], %16 {strides = array<i32>} : memref<2x256xf32, #tpu.memory_space<vmem>>, vector<2x256xf32>,
    %18 = tpu.iota {dimensions = array<i32: 0>} : vector<12x128xi32>
    %c1 = arith.constant 1 : index
    %19 = memref.load %arg0[%c1] : memref<2xi32, #tpu.memory_space<smem>>
    %20 = arith.index_cast %19 : i32 to index
    %21 = memref.load %arg1[%20] : memref<1000xf32, #tpu.memory_space<smem>>
    %22 = vector.broadcast %21 : f32 to vector<12x128xf32>
    %c1_20 = arith.constant 1 : index
    %23 = memref.load %arg0[%c1_20] : memref<2xi32, #tpu.memory_space<smem>>
    %24 = arith.index_cast %23 : i32 to index
    %25 = memref.load %arg2[%24] : memref<1000xf32, #tpu.memory_space<smem>>
    %26 = vector.broadcast %25 : f32 to vector<12x128xf32>
    %c6_i32 = arith.constant 6 : i32
    %27 = vector.broadcast %c6_i32 : i32 to vector<12x128xi32>
    %28 = arith.cmpi slt, %18, %27 : vector<12x128xi32>
    %c0_21 = arith.constant 0 : index
    %29 = memref.load %arg0[%c0_21] : memref<2xi32, #tpu.memory_space<smem>>
    %30 = arith.index_cast %29 : i32 to index
    %31 = memref.load %arg1[%30] : memref<1000xf32, #tpu.memory_space<smem>>
    %32 = vector.broadcast %31 : f32 to vector<12x128xf32>
    %33 = arith.select %28, %32, %22 : vector<12x128xi1>, vector<12x128xf32>
    %c0_22 = arith.constant 0 : index
    %34 = memref.load %arg0[%c0_22] : memref<2xi32, #tpu.memory_space<smem>>
    %35 = arith.index_cast %34 : i32 to index
    %36 = memref.load %arg2[%35] : memref<1000xf32, #tpu.memory_space<smem>>
    %37 = vector.broadcast %36 : f32 to vector<12x128xf32>
    %38 = arith.select %28, %37, %26 : vector<12x128xi1>, vector<12x128xf32>
    %c0_23 = arith.constant 0 : index
    %c0_24 = arith.constant 0 : index
    %39 = vector.load %arg8[%c0_23, %c0_24] : memref<12x128xf32, #tpu.memory_space<vmem>>, vector<12x128xf32>
    %40 = arith.mulf %33, %39 : vector<12x128xf32>
    %c0_25 = arith.constant 0 : index
    %c0_26 = arith.constant 0 : index
    %41 = vector.load %arg9[%c0_25, %c0_26] : memref<12x128xf32, #tpu.memory_space<vmem>>, vector<12x128xf32>
    %42 = arith.mulf %38, %41 : vector<12x128xf32>
    %43 = arith.addf %40, %42 : vector<12x128xf32>
    %c0_27 = arith.constant 0 : index
    %c0_28 = arith.constant 0 : index
    %44 = vector.load %arg11[%c0_27, %c0_28] : memref<12x128xf32, #tpu.memory_space<vmem>>, vector<12x128xf32>
    tpu.vector_store %arg11[%c0_27, %c0_28], %43 {strides = array<i32>} : memref<12x128xf32, #tpu.memory_space<vmem>>, vector<12x128xf32>,
    return
  }
}

</mosaic_0001>

<bundles_post_ra>
// kernel: au_pix2pix_forward.1
= control target key start
LH: loop header
LB: loop body
LE: loop exit
PB: predicated region body
PF: predicated region fallthrough
CT: control target
= control target key end

     0   :  { %17 = vsyncpa [#allocation4], 0  ;;  %s679_s0 = inlined_call_operand.vmem [shape: s32[2], index: 0, kind: input, shape index: {}]   ;;  %s680_s1 = inlined_call_operand.vmem [shape: f32[1000], index: 1, kind: input, shape index: {}]   ;;  %s681_s2 = inlined_call_operand.vmem [shape: f32[1000], index: 2, kind: input, shape index: {}]   ;;  %s682_s3 = inlined_call_operand.vmem [shape: f32[2,17], index: 3, kind: input, shape index: {}]   ;;  %s683_s4 = inlined_call_operand.vmem [shape: f32[128,64], index: 4, kind: input, shape index: {}]   ;;  %s684_s5 = inlined_call_operand.vmem [shape: f32[1,64], index: 5, kind: input, shape index: {}]   ;;  %s685_s6 = inlined_call_operand.vmem [shape: f32[64,256], index: 6, kind: input, shape index: {}]   ;;  %s686_s7 = inlined_call_operand.vmem [shape: f32[1,256], index: 7, kind: input, shape index: {}]   ;;  %s687_s8 = inlined_call_operand.vmem [shape: f32[12,128], index: 8, kind: input, shape index: {}]   ;;  %s688_s9 = inlined_call_operand.vmem [shape: f32[12,128], index: 9, kind: input, shape index: {}]   ;;  %s689_s10 = inlined_call_operand.vmem [shape: f32[2,256], index: 10, kind: output, shape index: {0}]   ;;  %s690_s11 = inlined_call_operand.vmem [shape: f32[12,128], index: 11, kind: output, shape index: {1}]  }
   0x1   :  { %18 = vsyncpa [#allocation6], 0  ;;  %s35_s19 = sshll.u32 %s680_s1, 4  ;;  %s25_s22 = sshll.u32 %s679_s0, 4  ;;  %s36_s19 = int_to_ptr.vmem [resolvable:$true] %s35_s19  ;;  %s26_s22 = int_to_ptr.vmem [resolvable:$true] %s25_s22 }
   0x2   :  { %s430_s23 = scalar_lea.vmem %s36_s19, 128  ;;  %p435_p1 = scmp.lt.s32.totalorder %s36_s19, %s36_s19 }
   0x3   :  { %p431_p0 = scmp.ne.s32.totalorder %s36_s19, %s430_s23  ;;  %p436_p2 = scmp.lt.s32.totalorder %s430_s23, %s430_s23 }
   0x5   :  { %p437_p3 = por %p436_p2, %p435_p1 }
   0x7   :  { %p438_p4 = pnand %p437_p3, %p431_p0 }
   0x9   :  { %441 = shalt.err (!%p438_p4)
}
   0xa   :  { %s470_s24 = smov [#allocation5]   ;;  %s442_s25 = scalar_lea.vmem %s26_s22, 16 }
   0xb   :  { %38 = dma.vmem_to_smem %s36_s19, 128, %s470_s24, [#allocation6]  }
   0xc   :  { %p443_p5 = scmp.ne.s32.totalorder %s26_s22, %s442_s25  ;;  %p447_p6 = scmp.lt.s32.totalorder %s26_s22, %s26_s22 }
   0xd   :  { %p448_p7 = scmp.lt.s32.totalorder %s442_s25, %s442_s25 }
   0xf   :  { %p449_p8 = por %p448_p7, %p447_p6 }
  0x11   :  { %p450_p9 = pnand %p449_p8, %p443_p5 }
  0x13   :  { %453 = shalt.err (!%p450_p9)
}
  0x14   :  { %s471_s1 = smov [#allocation3]   ;;  %s45_s27 = sshll.u32 %s681_s2, 4  ;;  %s46_s27 = int_to_ptr.vmem [resolvable:$true] %s45_s27 }
  0x15   :  { %28 = dma.vmem_to_smem %s26_s22, 16, %s471_s1, [#allocation4]  }
  0x16   :  { %s454_s28 = scalar_lea.vmem %s46_s27, 128  ;;  %p459_p11 = scmp.lt.s32.totalorder %s46_s27, %s46_s27 }
  0x17   :  { %p455_p10 = scmp.ne.s32.totalorder %s46_s27, %s454_s28  ;;  %p460_p12 = scmp.lt.s32.totalorder %s454_s28, %s454_s28 }
  0x19   :  { %p461_p13 = por %p460_p12, %p459_p11 }
  0x1b   :  { %p462_p0 = pnand %p461_p13, %p455_p10 }
  0x1d   :  { %465 = shalt.err (!%p462_p0)
}
  0x1e   :  { %s472_s29 = smov [#allocation7]  }
  0x1f   :  { %48 = dma.vmem_to_smem %s46_s27, 128, %s472_s29, [#allocation6]  }
  0x20   :  { %466 = dma.done.wait [#allocation4], 16  }
  0x21   :  { %467 = vsyncadd [#allocation4], 4294967280 }
  0x22   :  { %468 = dma.done.wait [#allocation6], 256  }
  0x23   :  { %469 = vsyncadd [#allocation6], 4294967040 }
  0x24   :  { %72 = sfence }
  0x25   :  { %v78_v0 = vld [vmem:[%s683_s4] sm:$0xff]  ;;  %v79_v1 = vld [vmem:[%s683_s4 + $0x8] sm:$0xff]  ;;  %v80_v2 = vld [vmem:[%s683_s4 + $0x10] sm:$0xff]  ;;  %v473_v3 = vmov 0.0|0.0   ;;  %v474_v6 = vmov 0.0   ;;  %vm475_vm0 = vmmov 0   ;;  %v190_v57 = vlaneseq }
  0x26   :  { %384 = vmatprep.subr.bf16.mxu0 %v473_v3  ;;  %v385_v4 = vpack.c.bf16 %v79_v1, %v78_v0  ;;  %v81_v5 = vld [vmem:[%s683_s4 + $0x18] sm:$0xff]  ;;  %73 = vst [vmem:[#allocation2] sm:$0x3] %v474_v6  ;;  %268 = vmatprep.mubr.f32.mxu1 %v474_v6  ;;  %vm75_vm1 = vcmask 132096   ;;  %v82_v8 = vld [vmem:[%s683_s4 + $0x20] sm:$0xff]  ;;  %v83_v9 = vld [vmem:[%s683_s4 + $0x28] sm:$0xff] }
  0x27   :  { %381 = vmatprep.mubr.msk.f32.mxu0 %vm475_vm0, %v474_v6  ;;  %v388_v7 = vpack.c.bf16 %v81_v5, %v80_v2  ;;  %v74_v10 = vld [vmem:[%s682_s3] sm:$0x3]  ;;  %v173_v11 = vld [vmem:[%s685_s6 + $0x8] sm:$0xff]  ;;  %v84_v12 = vld [vmem:[%s683_s4 + $0x30] sm:$0xff]  ;;  %v391_v17 = vpack.c.bf16 %v83_v9, %v82_v8  ;;  %vm200_vm2 = vcmask 523264   ;;  %s331_s29 = sld [smem:[#allocation3 + $0x1]] }
  0x28   :  { %386 = vmatpush3.bf16.msra.mxu0 %v385_v4  ;;  %v85_v13 = vld [vmem:[%s683_s4 + $0x38] sm:$0xff]  ;;  %76 = vst.msk [vmem:[#allocation2] sm:$0x3] %vm75_vm1, %v74_v10  ;;  %v172_v15 = vld [vmem:[%s685_s6] sm:$0xff]  ;;  %v174_v16 = vld [vmem:[%s685_s6 + $0x10] sm:$0xff]  ;;  %s297_s30 = sld [smem:[#allocation3]] }
  0x29   :  { %387 = vmatprep.subr.bf16.mxu0 %v473_v3  ;;  %v175_v14 = vld [vmem:[%s685_s6 + $0x18] sm:$0xff]  ;;  %v410_v19 = vpack.c.bf16 %v174_v16, %v172_v15  ;;  %v177_v20 = vld [vmem:[%s685_s6 + $0x28] sm:$0xff]  ;;  %v176_v22 = vld [vmem:[%s685_s6 + $0x20] sm:$0xff]  ;;  %v394_v28 = vpack.c.bf16 %v85_v13, %v84_v12  ;;  %v191_v58 = vshrl.u32 %v190_v57, 7 }
  0x2a   :  { %v408_v18 = vpack.c.bf16 %v175_v14, %v173_v11  ;;  %v179_v21 = vld [vmem:[%s685_s6 + $0x38] sm:$0xff]  ;;  %v178_v24 = vld [vmem:[%s685_s6 + $0x30] sm:$0xff]  ;;  %v181_v25 = vld [vmem:[%s685_s6 + $0x48] sm:$0xff] }
  0x2b   :  { %v412_v23 = vpack.c.bf16 %v179_v21, %v177_v20  ;;  %v183_v26 = vld [vmem:[%s685_s6 + $0x58] sm:$0xff]  ;;  %v414_v27 = vpack.c.bf16 %v178_v24, %v176_v22  ;;  %v180_v30 = vld [vmem:[%s685_s6 + $0x40] sm:$0xff]  ;;  %v182_v31 = vld [vmem:[%s685_s6 + $0x50] sm:$0xff]  ;;  %vm295_vm3 = vcmp.lt.s32.totalorder %v191_v58, 6  ;;  %v192_v11 = vsub.s32 0, %v191_v58 }
  0x2c   :  { %389 = vmatpush3.bf16.msra.mxu0 %v388_v7  ;;  %409 = vmatprep.subr.bf16.mxu1 %v408_v18  ;;  %v416_v29 = vpack.c.bf16 %v183_v26, %v181_v25  ;;  %v86_v32 = vld [vmem:[%s683_s4 + $0x40] sm:$0xff]  ;;  %v87_v33 = vld [vmem:[%s683_s4 + $0x48] sm:$0xff]  ;;  %v418_v34 = vpack.c.bf16 %v182_v31, %v180_v30  ;;  %v88_v36 = vld [vmem:[%s683_s4 + $0x50] sm:$0xff]  ;;  %v196_v13 = vsub.s32 1, %v191_v58 }
  0x2d   :  { %390 = vmatprep.subr.bf16.mxu0 %v473_v3  ;;  %411 = vmatpush1.bf16.msra.mxu1 %v410_v19  ;;  %v397_v35 = vpack.c.bf16 %v87_v33, %v86_v32  ;;  %v89_v37 = vld [vmem:[%s683_s4 + $0x58] sm:$0xff]  ;;  %v90_v39 = vld [vmem:[%s683_s4 + $0x60] sm:$0xff]  ;;  %v91_v40 = vld [vmem:[%s683_s4 + $0x68] sm:$0xff]  ;;  %s291_s12 = sld [smem:[#allocation5 + %s331_s29]] }
  0x2e   :  { %413 = vmatprep.subr.bf16.mxu1 %v412_v23  ;;  %v400_v38 = vpack.c.bf16 %v89_v37, %v88_v36  ;;  %v403_v41 = vpack.c.bf16 %v91_v40, %v90_v39  ;;  %v92_v42 = vld [vmem:[%s683_s4 + $0x70] sm:$0xff]  ;;  %v93_v43 = vld [vmem:[%s683_s4 + $0x78] sm:$0xff]  ;;  %v185_v46 = vld [vmem:[%s685_s6 + $0x68] sm:$0xff]  ;;  %s293_s3 = sld [smem:[#allocation7 + %s331_s29]] }
  0x2f   :  { %v406_v44 = vpack.c.bf16 %v93_v43, %v92_v42  ;;  %v77_v45 = vld [vmem:[#allocation2] sm:$0x3]  ;;  %v187_v47 = vld [vmem:[%s685_s6 + $0x78] sm:$0xff]  ;;  %v186_v50 = vld [vmem:[%s685_s6 + $0x70] sm:$0xff]  ;;  %s298_s2 = sld [smem:[#allocation5 + %s297_s30]] }
  0x30   :  { %392 = vmatpush3.bf16.msra.mxu0 %v391_v17  ;;  %v420_v48 = vpack.c.bf16 %v187_v47, %v185_v46  ;;  %v184_v49 = vld [vmem:[%s685_s6 + $0x60] sm:$0xff]  ;;  %s302_s6 = sld [smem:[#allocation7 + %s297_s30]]  ;;  %v307_v0 = vld [vmem:[%s687_s8 + $0x8] sm:$0xf] }
  0x31   :  { %393 = vmatprep.subr.bf16.mxu0 %v473_v3  ;;  %415 = vmatpush1.bf16.msra.mxu1 %v414_v27  ;;  %v422_v51 = vpack.c.bf16 %v186_v50, %v184_v49  ;;  %v328_v52 = vld [vmem:[%s684_s5] ss:$0 sm:$0xff]  ;;  %v311_v5 = vld [vmem:[%s688_s9 + $0x8] sm:$0xf] }
  0x32   :  { %417 = vmatprep.subr.bf16.mxu1 %v416_v29  ;;  %v306_v63 = vld [vmem:[%s687_s8] sm:$0xff] }
  0x33   :  { %v292_v59 = vstv %s291_s12  ;;  %v310_v4 = vld [vmem:[%s688_s9] sm:$0xff] }
  0x34   :  { %395 = vmatpush3.bf16.msra.mxu0 %v394_v28  ;;  %v294_v60 = vstv %s293_s3  ;;  %v188_v12 = vld [vmem:[%s686_s7] sm:$0x3] }
  0x35   :  { %396 = vmatprep.subr.bf16.mxu0 %v473_v3  ;;  %419 = vmatpush1.bf16.msra.mxu1 %v418_v34  ;;  %v299_v61 = vstv %s298_s2  ;;  %v313_v8 = vmul.f32 %v311_v5, %v294_v60  ;;  %v193_v14 = vrot.slane %v188_v12, %v192_v11  ;;  %v197_v15 = vrot.slane %v188_v12, %v196_v13 }
  0x36   :  { %421 = vmatprep.subr.bf16.mxu1 %v420_v48  ;;  %v303_v62 = vstv %s302_s6  ;;  %v300_v1 = vsel %vm295_vm3, %v299_v61, %v292_v59 }
  0x37   :  { %v304_v2 = vsel %vm295_vm3, %v303_v62, %v294_v60  ;;  %v308_v6 = vmul.f32 %v306_v63, %v300_v1 }
  0x38   :  { %398 = vmatpush3.bf16.msra.mxu0 %v397_v35  ;;  %v312_v7 = vmul.f32 %v310_v4, %v304_v2 }
  0x39   :  { %399 = vmatprep.subr.bf16.mxu0 %v473_v3  ;;  %423 = vmatpush1.bf16.msra.mxu1 %v422_v51 }
  0x3a   :  { %v314_v9 = vadd.f32 %v312_v7, %v308_v6 }
  0x3c   :  { %401 = vmatpush3.bf16.msra.mxu0 %v400_v38  ;;  %316 = vst [vmem:[%s690_s11] sm:$0xff] %v314_v9 }
  0x3d   :  { %402 = vmatprep.subr.bf16.mxu0 %v473_v3 }
  0x40   :  { %404 = vmatpush3.bf16.msra.mxu0 %v403_v41 }
  0x41   :  { %405 = vmatprep.subr.bf16.mxu0 %v473_v3  ;;  %v309_v3 = vmul.f32 %v307_v0, %v292_v59 }
  0x43   :  { %v315_v10 = vadd.f32 %v313_v8, %v309_v3 }
  0x44   :  { %407 = vmatpush3.bf16.msra.mxu0 %v406_v44 }
  0x45   :  { %317 = vst [vmem:[%s690_s11 + $0x8] sm:$0xf] %v315_v10 }
  0x47   :  { %382 = vmatmul.mubr.f32.vlgmr.msra.gmra.mrb[0].mxu0 %v77_v45 }
 0x11a   :  { %v167_v53 = vpop.f32.mrb[0].mxu0 }
 0x11b   :  { %v168_v54 = vadd.f32 %v328_v52, %v167_v53  ;;  %v383_v55 = vpop.f32.mrb[1].mxu0 }
 0x11d   :  { %v171_v56 = vmax.f32 %v168_v54, 0.0 }
 0x11f   :  { %329 = vmatmul.mubr.msk.f32.vlgmr.msra.gmra.mrb[0].mxu1 %vm200_vm2, %v171_v56 }
 0x1f2   :  { %v270_v16 = vpop.f32.mrb[0].mxu1 }
 0x1f3   :  { %v271_v17 = vadd.f32 %v270_v16, %v193_v14  ;;  %v272_v18 = vpop.f32.mrb[1].mxu1 }
 0x1f4   :  { %v273_v19 = vadd.f32 %v272_v18, %v197_v15 }
 0x1f6   :  { %v277_v20 = vcombine.low %v271_v17, %v273_v19 }
 0x1f8   :  { %330 = vst.sshfl [vmem:[%s689_s10] sm:$0x33 pattern:$0x76325410] %v277_v20 }
 0x1f9   :  { %326 = vsyncpa [#allocation4], 1 }
 0x1fa   :  { %327 = vsyncpa [#allocation6], 1 }

</bundles_post_ra>
